<compile_context>
chip_gen: v5e
topology: v5e:2x2
jax: 0.10.0
libtpu: 0.0.40
codegen_flags: <defaults>
</compile_context>

<pallas_src>
import jax
import jax.numpy as jnp
from jax import lax
from jax.experimental import pallas as pl
from jax.experimental.pallas import tpu as pltpu

HIDDEN = 4096
NUM_CLASSES = 3


def bow_kernel(xa_ref, w1a_ref, w2t_ref, b2_ref, o_ref):
    # Linear(D, 4096) with b1 folded in (ones column in x, b1 row in W1); MXU matmul,
    # f32 accumulation regardless of input dtype.
    h = jnp.dot(xa_ref[...], w1a_ref[...], preferred_element_type=jnp.float32)
    h = jnp.maximum(h, 0.0)

    # Linear(4096, 3) with lane-dense [3, H] weights: transposed contraction (h dim 1
    # against w2t dim 1), f32 accumulation, plus the tiny b2 bias.
    logits = lax.dot_general(
        h, w2t_ref[...],
        dimension_numbers=(((1,), (1,)), ((), ())),
        preferred_element_type=jnp.float32,
    ) + b2_ref[...]

    # Softmax over the 3 classes (numerically stable, exact division).
    m = jnp.max(logits, axis=1, keepdims=True)
    e = jnp.exp(logits - m)
    o_ref[...] = (e / jnp.sum(e, axis=1, keepdims=True)).astype(o_ref.dtype)


def prepare_params(w1, b1, w2, b2, *, weight_dtype=jnp.float32):
    """One-time parameter prep (do NOT call per forward).

    w1: [D, H], b1: [H], w2: [H, 3], b2: [3]  (already transposed from PyTorch layout)
    Returns (w1_aug [D+1, H] in weight_dtype, w2t [3, H] f32, b2 [1, 3] f32).
    """
    D, H = w1.shape
    w1_aug = jnp.concatenate([w1, b1.reshape(1, H)], axis=0).astype(weight_dtype)
    w2t = jnp.transpose(w2).astype(jnp.float32)          # [3, H], lane-dense
    b2r = jnp.asarray(b2, jnp.float32).reshape(1, NUM_CLASSES)
    return w1_aug, w2t, b2r


def bow_forward(x, w1_aug, w2t, b2r):
    """x: [B, D]; w1_aug: [D+1, H]; w2t: [3, H]; b2r: [1, 3]. Returns [B, 3] f32."""
    B, D = x.shape
    Daug, H = w1_aug.shape
    C = w2t.shape[0]
    assert Daug == D + 1 and w2t.shape == (NUM_CLASSES, H)

    # Fold b1 via a ones column; match x dtype to the weight dtype for the MXU.
    x_aug = jnp.concatenate([x, jnp.ones((B, 1), x.dtype)], axis=1).astype(w1_aug.dtype)

    itemsize = jnp.dtype(w1_aug.dtype).itemsize
    cost = pl.CostEstimate(
        flops=2 * B * H * (Daug + C),
        transcendentals=B * C,
        bytes_accessed=(x_aug.size * itemsize + w1_aug.size * itemsize
                        + w2t.size * 4 + b2r.size * 4 + B * C * 4),
    )

    vmem_full = pl.BlockSpec(memory_space=pltpu.MemorySpace.VMEM)  # whole array, resident
    return pl.pallas_call(
        bow_kernel,
        out_shape=jax.ShapeDtypeStruct((B, NUM_CLASSES), jnp.float32),
        in_specs=[vmem_full, vmem_full, vmem_full, vmem_full],
        out_specs=vmem_full,
        cost_estimate=cost,
    )(x_aug, w1_aug, w2t, b2r)


def reference(x, w1, b1, w2, b2):
    h = jnp.maximum(x @ w1 + b1, 0.0)
    logits = h @ w2 + b2
    return jax.nn.softmax(logits, axis=1)


if __name__ == "__main__":
    B, D = 8, 32  # small input_size for the synthetic test
    key = jax.random.PRNGKey(0)
    kx, k1, k2, k3, k4 = jax.random.split(key, 5)

    x = jax.random.normal(kx, (B, D), jnp.float32)
    # PyTorch shapes: W1 [4096, D], W2 [3, 4096]; stored transposed for [B,D] @ [D,H].
    w1 = jax.random.normal(k1, (D, HIDDEN), jnp.float32) * 0.05
    b1 = jax.random.normal(k2, (HIDDEN,), jnp.float32) * 0.05
    w2 = jax.random.normal(k3, (HIDDEN, NUM_CLASSES), jnp.float32) * 0.05
    b2 = jax.random.normal(k4, (NUM_CLASSES,), jnp.float32) * 0.05

    ref = reference(x, w1, b1, w2, b2)

    # f32 validation path: exact semantics of the PyTorch module.
    params_f32 = prepare_params(w1, b1, w2, b2, weight_dtype=jnp.float32)
    out_f32 = jax.block_until_ready(bow_forward(x, *params_f32))
    assert out_f32.shape == (B, NUM_CLASSES)
    assert jnp.allclose(out_f32, ref, atol=1e-5, rtol=1e-5), "f32 path mismatch vs reference"

    # bf16-weight fast path: halves the dominant W1 HBM read (f32 accumulation kept).
    params_bf16 = prepare_params(w1, b1, w2, b2, weight_dtype=jnp.bfloat16)
    out_bf16 = jax.block_until_ready(bow_forward(x, *params_bf16))
    assert out_bf16.shape == (B, NUM_CLASSES)
    assert jnp.allclose(out_bf16, ref, atol=3e-2, rtol=3e-2), "bf16 path mismatch vs reference"

    print("KERNEL_OK")
</pallas_src>

<mosaic_0001>
module attributes {stable_mosaic.version = 11 : i64} {
  func.func @bow_kernel(%arg0: memref<8x33xf32, #tpu.memory_space<vmem>>, %arg1: memref<33x4096xf32, #tpu.memory_space<vmem>>, %arg2: memref<3x4096xf32, #tpu.memory_space<vmem>>, %arg3: memref<1x3xf32, #tpu.memory_space<vmem>>, %arg4: memref<8x3xf32, #tpu.memory_space<vmem>>) attributes {dimension_semantics = [], scalar_prefetch = 0 : i64, scratch_operands = 0 : i64, tpu.core_type = #tpu.core_type<tc>} {
    %c0 = arith.constant 0 : index
    %c0_0 = arith.constant 0 : index
    %0 = vector.load %arg0[%c0, %c0_0] : memref<8x33xf32, #tpu.memory_space<vmem>>, vector<8x33xf32>
    %c0_1 = arith.constant 0 : index
    %c0_2 = arith.constant 0 : index
    %1 = vector.load %arg1[%c0_1, %c0_2] : memref<33x4096xf32, #tpu.memory_space<vmem>>, vector<33x4096xf32>
    %cst = arith.constant dense<0.000000e+00> : vector<8x4096xf32>
    %2 = tpu.matmul %0, %1, %cst {dimension_numbers = #tpu.dot_dimension_numbers<[1], [0], [0], [1], [0, 0, 1, 1], [], []>} : vector<8x33xf32>, vector<33x4096xf32>, vector<8x4096xf32> -> vector<8x4096xf32>
    %cst_3 = arith.constant 0.000000e+00 : f32
    %3 = vector.broadcast %cst_3 : f32 to vector<8x4096xf32>
    %4 = arith.maximumf %2, %3 : vector<8x4096xf32>
    %c0_4 = arith.constant 0 : index
    %c0_5 = arith.constant 0 : index
    %5 = vector.load %arg2[%c0_4, %c0_5] : memref<3x4096xf32, #tpu.memory_space<vmem>>, vector<3x4096xf32>
    %cst_6 = arith.constant dense<0.000000e+00> : vector<8x3xf32>
    %6 = tpu.matmul %4, %5, %cst_6 {dimension_numbers = #tpu.dot_dimension_numbers<[1], [1], [0], [0], [0, 0, 1, 0], [], []>} : vector<8x4096xf32>, vector<3x4096xf32>, vector<8x3xf32> -> vector<8x3xf32>
    %c0_7 = arith.constant 0 : index
    %c0_8 = arith.constant 0 : index
    %7 = vector.load %arg3[%c0_7, %c0_8] : memref<1x3xf32, #tpu.memory_space<vmem>>, vector<1x3xf32>
    %8 = vector.broadcast %7 : vector<1x3xf32> to vector<8x3xf32>
    %9 = arith.addf %6, %8 : vector<8x3xf32>
    %cst_9 = arith.constant dense<0xFF800000> : vector<8xf32>
    %10 = vector.multi_reduction <maximumf>, %9, %cst_9 [1] : vector<8x3xf32> to vector<8xf32>
    %11 = vector.shape_cast %10 : vector<8xf32> to vector<8x1xf32>
    %12 = vector.broadcast %11 : vector<8x1xf32> to vector<8x3xf32>
    %13 = arith.subf %9, %12 : vector<8x3xf32>
    %14 = math.exp %13 : vector<8x3xf32>
    %cst_10 = arith.constant dense<0.000000e+00> : vector<8xf32>
    %15 = vector.multi_reduction <add>, %14, %cst_10 [1] : vector<8x3xf32> to vector<8xf32>
    %16 = vector.shape_cast %15 : vector<8xf32> to vector<8x1xf32>
    %17 = vector.broadcast %16 : vector<8x1xf32> to vector<8x3xf32>
    %18 = arith.divf %14, %17 : vector<8x3xf32>
    %c0_11 = arith.constant 0 : index
    %c0_12 = arith.constant 0 : index
    %19 = vector.load %arg4[%c0_11, %c0_12] : memref<8x3xf32, #tpu.memory_space<vmem>>, vector<8x3xf32>
    tpu.vector_store %arg4[%c0_11, %c0_12], %18 {strides = array<i32>} : memref<8x3xf32, #tpu.memory_space<vmem>>, vector<8x3xf32>,
    return
  }
}

</mosaic_0001>

<bundles_post_ra>
// kernel: tpu_custom_call.1
= control target key start
LH: loop header
LB: loop body
LE: loop exit
PB: predicated region body
PF: predicated region fallthrough
CT: control target
= control target key end

     0   :  { %9 = vsyncpa [#allocation3], 0  ;;  %s2093_s0 = inlined_call_operand.hbm [shape: f32[8,33], index: 0, kind: input, shape index: {}]   ;;  %s2094_s1 = inlined_call_operand.hbm [shape: f32[33,4096], index: 1, kind: input, shape index: {}]   ;;  %s2095_s2 = inlined_call_operand.hbm [shape: f32[3,4096], index: 2, kind: input, shape index: {}]   ;;  %s2096_s3 = inlined_call_operand.vmem [shape: f32[1,3], index: 3, kind: input, shape index: {}]   ;;  %s2097_s4 = inlined_call_operand.vmem [shape: f32[8,3], index: 4, kind: output, shape index: {}]  }
   0x1   :  { %10 = vsyncpa [#allocation5], 0  ;;  %s26_s17 = sshll.u32 %s2094_s1, 4  ;;  %s1935_s18 = smov [#allocation4]   ;;  %s27_s17 = int_to_ptr.hbm [resolvable:$true] %s26_s17 }
   0x2   :  { %s28_s19 = sshll.u32 %s1935_s18, 4  ;;  %s16_s22 = sshll.u32 %s2093_s0, 4  ;;  %s29_s19 = int_to_ptr.vmem [resolvable:$true] %s28_s19  ;;  %s17_s22 = int_to_ptr.hbm [resolvable:$true] %s16_s22 }
   0x3   :  { %s1936_s23 = smov 4096   ;;  %s1937_s24 = smov 256  }
   0x4   :  { %34 = dma.hbm_to_vmem [thread:$0]  %s27_s17, 20480, %s29_s19, [#allocation5], %s1936_s23, %s1936_s23, %s1937_s24  }
   0x5   :  { %s1938_s25 = smov [#allocation2]   ;;  %s40_s29 = sshll.u32 %s2095_s2, 4  ;;  %s41_s29 = int_to_ptr.hbm [resolvable:$true] %s40_s29 }
   0x6   :  { %s18_s26 = sshll.u32 %s1938_s25, 4  ;;  %s1939_s1 = smov [#allocation6]   ;;  %s19_s26 = int_to_ptr.vmem [resolvable:$true] %s18_s26 }
   0x7   :  { %21 = dma.hbm_to_vmem [thread:$0]  %s17_s22, 128, %s19_s26, [#allocation3]  }
   0x8   :  { %s42_s30 = sshll.u32 %s1939_s1, 4  ;;  %s43_s30 = int_to_ptr.vmem [resolvable:$true] %s42_s30 }
   0x9   :  { %45 = dma.hbm_to_vmem [thread:$0]  %s41_s29, 2048, %s43_s30, [#allocation5]  }
   0xa   :  { %1931 = dma.done.wait [#allocation3], 128  }
   0xb   :  { %1932 = vsyncadd [#allocation3], 4294967168 }
   0xc   :  { %1933 = dma.done.wait [#allocation5], 22528  }
   0xd   :  { %1934 = vsyncadd [#allocation5], 4294944768  ;;  %vm225_vm0 = vcmask 1040384   ;;  %v191_v0 = vld [vmem:[#allocation4 + $0x410] sm:$0x1]  ;;  %v160_v3 = vld [vmem:[#allocation4 + $0x318] sm:$0xff] }
   0xe   :  { %v159_v1 = vld [vmem:[#allocation4 + $0x310] sm:$0xff]  ;;  %v192_v2 = vld [vmem:[#allocation4 + $0x418] sm:$0x1]  ;;  %1789 = vmatpush.msk.msra.mxu2 %vm225_vm0, %v191_v0  ;;  %v189_v6 = vld [vmem:[#allocation4 + $0x400] sm:$0x1]  ;;  %vm221_vm1 = vcmask 269312  }
   0xf   :  { %1791 = vmatpush.msk.msra.mxu3 %vm225_vm0, %v192_v2  ;;  %v127_v4 = vld [vmem:[#allocation4 + $0x210] sm:$0xff]  ;;  %v128_v5 = vld [vmem:[#allocation4 + $0x218] sm:$0xff]  ;;  %v157_v7 = vld [vmem:[#allocation4 + $0x300] sm:$0xff]  ;;  %1785 = vmatpush.msk.msra.mxu0 %vm225_vm0, %v189_v6  ;;  %vm1753_vm2 = vcmask 23552  }
  0x10   :  { %374 = vmatpush.msra.mxu2 %v159_v1  ;;  %v95_v8 = vld [vmem:[#allocation4 + $0x110] sm:$0xff]  ;;  %v96_v9 = vld [vmem:[#allocation4 + $0x118] sm:$0xff]  ;;  %v190_v10 = vld [vmem:[#allocation4 + $0x408] sm:$0x1] }
  0x11   :  { %394 = vmatpush.msra.mxu3 %v160_v3  ;;  %v125_v11 = vld [vmem:[#allocation4 + $0x200] sm:$0xff]  ;;  %v158_v12 = vld [vmem:[#allocation4 + $0x308] sm:$0xff]  ;;  %v63_v13 = vld [vmem:[#allocation4 + $0x10] sm:$0xff]  ;;  %334 = vmatpush.msra.mxu0 %v157_v7 }
  0x12   :  { %375 = vmatpush.msra.mxu2 %v127_v4  ;;  %1787 = vmatpush.msk.msra.mxu1 %vm225_vm0, %v190_v10  ;;  %v64_v14 = vld [vmem:[#allocation4 + $0x18] sm:$0xff]  ;;  %v195_v15 = vld [vmem:[#allocation4 + $0x430] sm:$0x1]  ;;  %v93_v17 = vld [vmem:[#allocation4 + $0x100] sm:$0xff] }
  0x13   :  { %395 = vmatpush.msra.mxu3 %v128_v5  ;;  %v196_v16 = vld [vmem:[#allocation4 + $0x438] sm:$0x1]  ;;  %335 = vmatpush.msra.mxu0 %v125_v11  ;;  %v126_v18 = vld [vmem:[#allocation4 + $0x208] sm:$0xff]  ;;  %v163_v19 = vld [vmem:[#allocation4 + $0x330] sm:$0xff] }
  0x14   :  { %376 = vmatpush.msra.mxu2 %v95_v8  ;;  %354 = vmatpush.msra.mxu1 %v158_v12  ;;  %v164_v20 = vld [vmem:[#allocation4 + $0x338] sm:$0xff]  ;;  %v61_v21 = vld [vmem:[#allocation4] sm:$0xff]  ;;  %v94_v22 = vld [vmem:[#allocation4 + $0x108] sm:$0xff] }
  0x15   :  { %396 = vmatpush.msra.mxu3 %v96_v9  ;;  %v131_v23 = vld [vmem:[#allocation4 + $0x230] sm:$0xff]  ;;  %336 = vmatpush.msra.mxu0 %v93_v17  ;;  %v132_v24 = vld [vmem:[#allocation4 + $0x238] sm:$0xff]  ;;  %v193_v26 = vld [vmem:[#allocation4 + $0x420] sm:$0x1] }
  0x16   :  { %377 = vmatpush.msra.mxu2 %v63_v13  ;;  %355 = vmatpush.msra.mxu1 %v126_v18  ;;  %v1980_v25 = vld [vmem:[#allocation2] sm:$0xff]  ;;  %v99_v27 = vld [vmem:[#allocation4 + $0x130] sm:$0xff]  ;;  %v62_v29 = vld [vmem:[#allocation4 + $0x8] sm:$0xff] }
  0x17   :  { %397 = vmatpush.msra.mxu3 %v64_v14  ;;  %337 = vmatpush.msra.mxu0 %v61_v21  ;;  %v100_v28 = vld [vmem:[#allocation4 + $0x138] sm:$0xff]  ;;  %v67_v30 = vld [vmem:[#allocation4 + $0x30] sm:$0xff]  ;;  %v161_v31 = vld [vmem:[#allocation4 + $0x320] sm:$0xff] }
  0x18   :  { %1797 = vmatpush.msk.msrb.mxu2 %vm225_vm0, %v195_v15  ;;  %356 = vmatpush.msra.mxu1 %v94_v22  ;;  %v199_v32 = vld [vmem:[#allocation4 + $0x450] sm:$0x1]  ;;  %v194_v33 = vld [vmem:[#allocation4 + $0x428] sm:$0x1]  ;;  %v68_v34 = vld [vmem:[#allocation4 + $0x38] sm:$0xff] }
  0x19   :  { %1799 = vmatpush.msk.msrb.mxu3 %vm225_vm0, %v196_v16  ;;  %1790 = vmatmul.msk.f32.vlgmr.msra.gmra.mxu2 %vm221_vm1, %v1980_v25  ;;  %v129_v35 = vld [vmem:[#allocation4 + $0x220] sm:$0xff]  ;;  %v167_v36 = vld [vmem:[#allocation4 + $0x350] sm:$0xff]  ;;  %v200_v37 = vld [vmem:[#allocation4 + $0x458] sm:$0x1] }
  0x1a   :  { %454 = vmatpush.msrb.mxu2 %v163_v19  ;;  %1793 = vmatpush.msk.msrb.mxu0 %vm225_vm0, %v193_v26  ;;  %v162_v38 = vld [vmem:[#allocation4 + $0x328] sm:$0xff]  ;;  %v97_v39 = vld [vmem:[#allocation4 + $0x120] sm:$0xff]  ;;  %v135_v40 = vld [vmem:[#allocation4 + $0x250] sm:$0xff] }
  0x1b   :  { %474 = vmatpush.msrb.mxu3 %v164_v20  ;;  %357 = vmatpush.msra.mxu1 %v62_v29  ;;  %v168_v41 = vld [vmem:[#allocation4 + $0x358] sm:$0xff]  ;;  %v130_v42 = vld [vmem:[#allocation4 + $0x228] sm:$0xff]  ;;  %v103_v44 = vld [vmem:[#allocation4 + $0x150] sm:$0xff] }
  0x1c   :  { %455 = vmatpush.msrb.mxu2 %v131_v23  ;;  %1792 = vmatmul.msk.f32.vlgmr.msra.gmra.mxu3 %vm221_vm1, %v1980_v25  ;;  %v136_v43 = vld [vmem:[#allocation4 + $0x258] sm:$0xff]  ;;  %v65_v45 = vld [vmem:[#allocation4 + $0x20] sm:$0xff]  ;;  %v98_v46 = vld [vmem:[#allocation4 + $0x128] sm:$0xff] }
  0x1d   :  { %475 = vmatpush.msrb.mxu3 %v132_v24  ;;  %414 = vmatpush.msrb.mxu0 %v161_v31  ;;  %v197_v47 = vld [vmem:[#allocation4 + $0x440] sm:$0x1]  ;;  %v71_v48 = vld [vmem:[#allocation4 + $0x50] sm:$0xff]  ;;  %v104_v49 = vld [vmem:[#allocation4 + $0x158] sm:$0xff] }
  0x1e   :  { %456 = vmatpush.msrb.mxu2 %v99_v27  ;;  %1795 = vmatpush.msk.msrb.mxu1 %vm225_vm0, %v194_v33  ;;  %v66_v50 = vld [vmem:[#allocation4 + $0x28] sm:$0xff]  ;;  %v203_v51 = vld [vmem:[#allocation4 + $0x470] sm:$0x1]  ;;  %v165_v52 = vld [vmem:[#allocation4 + $0x340] sm:$0xff] }
  0x1f   :  { %476 = vmatpush.msrb.mxu3 %v100_v28  ;;  %415 = vmatpush.msrb.mxu0 %v129_v35  ;;  %v198_v53 = vld [vmem:[#allocation4 + $0x448] sm:$0x1]  ;;  %v72_v54 = vld [vmem:[#allocation4 + $0x58] sm:$0xff]  ;;  %v171_v55 = vld [vmem:[#allocation4 + $0x370] sm:$0xff] }
  0x20   :  { %457 = vmatpush.msrb.mxu2 %v67_v30  ;;  %434 = vmatpush.msrb.mxu1 %v162_v38  ;;  %v204_v56 = vld [vmem:[#allocation4 + $0x478] sm:$0x1]  ;;  %v133_v57 = vld [vmem:[#allocation4 + $0x240] sm:$0xff]  ;;  %v166_v58 = vld [vmem:[#allocation4 + $0x348] sm:$0xff] }
  0x21   :  { %477 = vmatpush.msrb.mxu3 %v68_v34  ;;  %416 = vmatpush.msrb.mxu0 %v97_v39  ;;  %v139_v59 = vld [vmem:[#allocation4 + $0x270] sm:$0xff]  ;;  %v172_v60 = vld [vmem:[#allocation4 + $0x378] sm:$0xff]  ;;  %v101_v61 = vld [vmem:[#allocation4 + $0x140] sm:$0xff] }
  0x22   :  { %1805 = vmatpush.msk.msra.mxu2 %vm225_vm0, %v199_v32  ;;  %435 = vmatpush.msrb.mxu1 %v130_v42  ;;  %v134_v62 = vld [vmem:[#allocation4 + $0x248] sm:$0xff]  ;;  %v140_v63 = vld [vmem:[#allocation4 + $0x278] sm:$0xff]  ;;  %v107_v0 = vld [vmem:[#allocation4 + $0x170] sm:$0xff] }
  0x23   :  { %1807 = vmatpush.msk.msra.mxu3 %vm225_vm0, %v200_v37  ;;  %1786 = vmatmul.msk.f32.vlgmr.msra.gmra.mxu0 %vm221_vm1, %v1980_v25  ;;  %v69_v1 = vld [vmem:[#allocation4 + $0x40] sm:$0xff]  ;;  %v102_v2 = vld [vmem:[#allocation4 + $0x148] sm:$0xff]  ;;  %v75_v4 = vld [vmem:[#allocation4 + $0x70] sm:$0xff] }
  0x24   :  { %534 = vmatpush.msra.mxu2 %v167_v36  ;;  %417 = vmatpush.msrb.mxu0 %v65_v45  ;;  %v201_v3 = vld [vmem:[#allocation4 + $0x460] sm:$0x1]  ;;  %v108_v5 = vld [vmem:[#allocation4 + $0x178] sm:$0xff]  ;;  %v70_v6 = vld [vmem:[#allocation4 + $0x48] sm:$0xff] }
  0x25   :  { %554 = vmatpush.msra.mxu3 %v168_v41  ;;  %1798 = vmatmul.msk.f32.vlgmr.msrb.gmra.mxu2 %vm221_vm1, %v1980_v25  ;;  %v207_v7 = vld [vmem:[#allocation4 + $0x490] sm:$0x1]  ;;  %v169_v8 = vld [vmem:[#allocation4 + $0x360] sm:$0xff]  ;;  %v202_v9 = vld [vmem:[#allocation4 + $0x468] sm:$0x1] }
  0x26   :  { %535 = vmatpush.msra.mxu2 %v135_v40  ;;  %436 = vmatpush.msrb.mxu1 %v98_v46  ;;  %v76_v10 = vld [vmem:[#allocation4 + $0x78] sm:$0xff]  ;;  %v175_v11 = vld [vmem:[#allocation4 + $0x390] sm:$0xff]  ;;  %v137_v13 = vld [vmem:[#allocation4 + $0x260] sm:$0xff] }
  0x27   :  { %555 = vmatpush.msra.mxu3 %v136_v43  ;;  %1788 = vmatmul.msk.f32.vlgmr.msra.gmra.mxu1 %vm221_vm1, %v1980_v25  ;;  %v208_v12 = vld [vmem:[#allocation4 + $0x498] sm:$0x1]  ;;  %v170_v14 = vld [vmem:[#allocation4 + $0x368] sm:$0xff]  ;;  %v143_v16 = vld [vmem:[#allocation4 + $0x290] sm:$0xff] }
  0x28   :  { %536 = vmatpush.msra.mxu2 %v103_v44  ;;  %1800 = vmatmul.msk.f32.vlgmr.msrb.gmra.mxu3 %vm221_vm1, %v1980_v25  ;;  %v176_v15 = vld [vmem:[#allocation4 + $0x398] sm:$0xff]  ;;  %v105_v17 = vld [vmem:[#allocation4 + $0x160] sm:$0xff]  ;;  %v138_v18 = vld [vmem:[#allocation4 + $0x268] sm:$0xff] }
  0x29   :  { %1801 = vmatpush.msk.msra.mxu0 %vm225_vm0, %v197_v47  ;;  %556 = vmatpush.msra.mxu3 %v104_v49  ;;  %v111_v19 = vld [vmem:[#allocation4 + $0x190] sm:$0xff]  ;;  %v144_v20 = vld [vmem:[#allocation4 + $0x298] sm:$0xff]  ;;  %v73_v21 = vld [vmem:[#allocation4 + $0x60] sm:$0xff] }
  0x2a   :  { %537 = vmatpush.msra.mxu2 %v71_v48  ;;  %437 = vmatpush.msrb.mxu1 %v66_v50  ;;  %v106_v22 = vld [vmem:[#allocation4 + $0x168] sm:$0xff]  ;;  %v205_v23 = vld [vmem:[#allocation4 + $0x480] sm:$0x1]  ;;  %v79_v24 = vld [vmem:[#allocation4 + $0x90] sm:$0xff] }
  0x2b   :  { %494 = vmatpush.msra.mxu0 %v165_v52  ;;  %557 = vmatpush.msra.mxu3 %v72_v54  ;;  %v112_v26 = vld [vmem:[#allocation4 + $0x198] sm:$0xff]  ;;  %v74_v27 = vld [vmem:[#allocation4 + $0x68] sm:$0xff]  ;;  %v211_v28 = vld [vmem:[#allocation4 + $0x4b0] sm:$0x1] }
  0x2c   :  { %1813 = vmatpush.msk.msrb.mxu2 %vm225_vm0, %v203_v51  ;;  %1803 = vmatpush.msk.msra.mxu1 %vm225_vm0, %v198_v53  ;;  %v173_v29 = vld [vmem:[#allocation4 + $0x380] sm:$0xff]  ;;  %v206_v30 = vld [vmem:[#allocation4 + $0x488] sm:$0x1]  ;;  %v80_v31 = vld [vmem:[#allocation4 + $0x98] sm:$0xff] }
  0x2d   :  { %1815 = vmatpush.msk.msrb.mxu3 %vm225_vm0, %v204_v56  ;;  %495 = vmatpush.msra.mxu0 %v133_v57  ;;  %v179_v32 = vld [vmem:[#allocation4 + $0x3b0] sm:$0xff]  ;;  %v212_v33 = vld [vmem:[#allocation4 + $0x4b8] sm:$0x1]  ;;  %v141_v34 = vld [vmem:[#allocation4 + $0x280] sm:$0xff] }
  0x2e   :  { %614 = vmatpush.msrb.mxu2 %v171_v55  ;;  %514 = vmatpush.msra.mxu1 %v166_v58  ;;  %v174_v35 = vld [vmem:[#allocation4 + $0x388] sm:$0xff]  ;;  %v180_v36 = vld [vmem:[#allocation4 + $0x3b8] sm:$0xff]  ;;  %v147_v37 = vld [vmem:[#allocation4 + $0x2b0] sm:$0xff] }
  0x2f   :  { %634 = vmatpush.msrb.mxu3 %v172_v60  ;;  %1794 = vmatmul.msk.f32.vlgmr.msrb.gmra.mxu0 %vm221_vm1, %v1980_v25  ;;  %v109_v38 = vld [vmem:[#allocation4 + $0x180] sm:$0xff]  ;;  %v142_v39 = vld [vmem:[#allocation4 + $0x288] sm:$0xff]  ;;  %v115_v40 = vld [vmem:[#allocation4 + $0x1b0] sm:$0xff] }
  0x30   :  { %615 = vmatpush.msrb.mxu2 %v139_v59  ;;  %496 = vmatpush.msra.mxu0 %v101_v61  ;;  %v148_v41 = vld [vmem:[#allocation4 + $0x2b8] sm:$0xff]  ;;  %v77_v42 = vld [vmem:[#allocation4 + $0x80] sm:$0xff]  ;;  %v110_v43 = vld [vmem:[#allocation4 + $0x188] sm:$0xff] }
  0x31   :  { %515 = vmatpush.msra.mxu1 %v134_v62  ;;  %1806 = vmatmul.msk.f32.vlgmr.msra.gmra.mxu2 %vm221_vm1, %v1980_v25  ;;  %v209_v44 = vld [vmem:[#allocation4 + $0x4a0] sm:$0x1]  ;;  %v83_v45 = vld [vmem:[#allocation4 + $0xb0] sm:$0xff]  ;;  %v116_v46 = vld [vmem:[#allocation4 + $0x1b8] sm:$0xff] }
  0x32   :  { %635 = vmatpush.msrb.mxu3 %v140_v63  ;;  %616 = vmatpush.msrb.mxu2 %v107_v0  ;;  %v78_v47 = vld [vmem:[#allocation4 + $0x88] sm:$0xff]  ;;  %v215_v48 = vld [vmem:[#allocation4 + $0x4d0] sm:$0x1]  ;;  %v177_v49 = vld [vmem:[#allocation4 + $0x3a0] sm:$0xff] }
  0x33   :  { %1796 = vmatmul.msk.f32.vlgmr.msrb.gmra.mxu1 %vm221_vm1, %v1980_v25  ;;  %497 = vmatpush.msra.mxu0 %v69_v1  ;;  %v210_v50 = vld [vmem:[#allocation4 + $0x4a8] sm:$0x1]  ;;  %v84_v51 = vld [vmem:[#allocation4 + $0xb8] sm:$0xff]  ;;  %v183_v53 = vld [vmem:[#allocation4 + $0x3d0] sm:$0xff] }
  0x34   :  { %516 = vmatpush.msra.mxu1 %v102_v2  ;;  %1808 = vmatmul.msk.f32.vlgmr.msra.gmra.mxu3 %vm221_vm1, %v1980_v25  ;;  %v216_v52 = vld [vmem:[#allocation4 + $0x4d8] sm:$0x1]  ;;  %v145_v54 = vld [vmem:[#allocation4 + $0x2a0] sm:$0xff]  ;;  %v178_v55 = vld [vmem:[#allocation4 + $0x3a8] sm:$0xff] }
  0x35   :  { %1809 = vmatpush.msk.msrb.mxu0 %vm225_vm0, %v201_v3  ;;  %617 = vmatpush.msrb.mxu2 %v75_v4  ;;  %v151_v56 = vld [vmem:[#allocation4 + $0x2d0] sm:$0xff]  ;;  %v995_v57 = vld [vmem:[#allocation6 + $0x8] sm:$0x77]  ;;  %v994_v58 = vld [vmem:[#allocation6] sm:$0x77] }
  0x36   :  { %636 = vmatpush.msrb.mxu3 %v108_v5  ;;  %517 = vmatpush.msra.mxu1 %v70_v6  ;;  %v184_v59 = vld [vmem:[#allocation4 + $0x3d8] sm:$0xff]  ;;  %v113_v60 = vld [vmem:[#allocation4 + $0x1a0] sm:$0xff]  ;;  %1032 = vst [vmem:[#allocation1 + $0x10] ss:$2 sm:$0xff] %v995_v57  ;;  %v146_v61 = vld [vmem:[#allocation4 + $0x2a8] sm:$0xff] }
  0x37   :  { %1821 = vmatpush.msk.msra.mxu2 %vm225_vm0, %v207_v7  ;;  %574 = vmatpush.msrb.mxu0 %v169_v8  ;;  %v119_v62 = vld [vmem:[#allocation4 + $0x1d0] sm:$0xff]  ;;  %1030 = vst [vmem:[#allocation1] ss:$2 sm:$0xff] %v994_v58  ;;  %v152_v63 = vld [vmem:[#allocation4 + $0x2d8] sm:$0xff]  ;;  %v81_v0 = vld [vmem:[#allocation4 + $0xa0] sm:$0xff] }
  0x38   :  { %1811 = vmatpush.msk.msrb.mxu1 %vm225_vm0, %v202_v9  ;;  %637 = vmatpush.msrb.mxu3 %v76_v10  ;;  %v114_v1 = vld [vmem:[#allocation4 + $0x1a8] sm:$0xff]  ;;  %v213_v2 = vld [vmem:[#allocation4 + $0x4c0] sm:$0x1]  ;;  %v87_v3 = vld [vmem:[#allocation4 + $0xd0] sm:$0xff] }
  0x39   :  { %694 = vmatpush.msra.mxu2 %v175_v11  ;;  %575 = vmatpush.msrb.mxu0 %v137_v13  ;;  %v120_v4 = vld [vmem:[#allocation4 + $0x1d8] sm:$0xff]  ;;  %v82_v5 = vld [vmem:[#allocation4 + $0xa8] sm:$0xff]  ;;  %v219_v6 = vld [vmem:[#allocation4 + $0x4f0] sm:$0x1] }
  0x3a   :  { %1823 = vmatpush.msk.msra.mxu3 %vm225_vm0, %v208_v12  ;;  %594 = vmatpush.msrb.mxu1 %v170_v14  ;;  %v999_v7 = vld [vmem:[#allocation6 + $0x28] sm:$0x77]  ;;  %v181_v8 = vld [vmem:[#allocation4 + $0x3c0] sm:$0xff]  ;;  %v88_v13 = vld [vmem:[#allocation4 + $0xd8] sm:$0xff] }
  0x3b   :  { %1802 = vmatmul.msk.f32.vlgmr.msra.gmra.mxu0 %vm221_vm1, %v1980_v25  ;;  %1814 = vmatmul.msk.f32.vlgmr.msrb.gmra.mxu2 %vm221_vm1, %v1980_v25  ;;  %v214_v9 = vld [vmem:[#allocation4 + $0x4c8] sm:$0x1]  ;;  %v998_v10 = vld [vmem:[#allocation6 + $0x20] sm:$0x77]  ;;  %v187_v14 = vld [vmem:[#allocation4 + $0x3f0] sm:$0xff] }
  0x3c   :  { %714 = vmatpush.msra.mxu3 %v176_v15  ;;  %695 = vmatpush.msra.mxu2 %v143_v16  ;;  %v220_v15 = vld [vmem:[#allocation4 + $0x4f8] sm:$0x1] }
  0x3d   :  { %576 = vmatpush.msrb.mxu0 %v105_v17  ;;  %595 = vmatpush.msrb.mxu1 %v138_v18  ;;  %v2047_v11 = vld.sshfl [vmem:[#allocation1 + $0x10] sm:$0xff pattern:$0x75316420]  ;;  %v2049_v12 = vld.sshfl [vmem:[#allocation1 + $0x18] sm:$0xff pattern:$0x75316420] }
  0x3e   :  { %1816 = vmatmul.msk.f32.vlgmr.msrb.gmra.mxu3 %vm221_vm1, %v1980_v25  ;;  %1804 = vmatmul.msk.f32.vlgmr.msra.gmra.mxu1 %vm221_vm1, %v1980_v25  ;;  %1046 = vst [vmem:[#allocation1 + $0x10] ss:$2 sm:$0xff] %v999_v7  ;;  %v2055_v16 = vld.sshfl [vmem:[#allocation1] sm:$0xff pattern:$0x75316420]  ;;  %v149_v18 = vld [vmem:[#allocation4 + $0x2c0] sm:$0xff] }
  0x3f   :  { %696 = vmatpush.msra.mxu2 %v111_v19  ;;  %715 = vmatpush.msra.mxu3 %v144_v20  ;;  %v2057_v17 = vld.sshfl [vmem:[#allocation1 + $0x8] sm:$0xff pattern:$0x75316420]  ;;  %v182_v19 = vld [vmem:[#allocation4 + $0x3c8] sm:$0xff]  ;;  %v155_v20 = vld [vmem:[#allocation4 + $0x2f0] sm:$0xff] }
  0x40   :  { %577 = vmatpush.msrb.mxu0 %v73_v21  ;;  %596 = vmatpush.msrb.mxu1 %v106_v22  ;;  %1045 = vst [vmem:[#allocation1] ss:$2 sm:$0xff] %v998_v10  ;;  %v188_v21 = vld [vmem:[#allocation4 + $0x3f8] sm:$0xff]  ;;  %v117_v22 = vld [vmem:[#allocation4 + $0x1c0] sm:$0xff]  ;;  %v1007_v7 = vld [vmem:[#allocation6 + $0x68] sm:$0x77] }
  0x41   :  { %697 = vmatpush.msra.mxu2 %v79_v24  ;;  %716 = vmatpush.msra.mxu3 %v112_v26  ;;  %v123_v24 = vld [vmem:[#allocation4 + $0x1f0] sm:$0xff]  ;;  %v156_v26 = vld [vmem:[#allocation4 + $0x2f8] sm:$0xff] }
  0x42   :  { %1817 = vmatpush.msk.msra.mxu0 %vm225_vm0, %v205_v23  ;;  %597 = vmatpush.msrb.mxu1 %v74_v27  ;;  %v150_v23 = vld [vmem:[#allocation4 + $0x2c8] sm:$0xff]  ;;  %v85_v27 = vld [vmem:[#allocation4 + $0xc0] sm:$0xff]  ;;  %v1005_v57 = vld [vmem:[#allocation6 + $0x58] sm:$0x77] }
  0x43   :  { %1829 = vmatpush.msk.msrb.mxu2 %vm225_vm0, %v211_v28  ;;  %717 = vmatpush.msra.mxu3 %v80_v31  ;;  %v118_v28 = vld [vmem:[#allocation4 + $0x1c8] sm:$0xff]  ;;  %v124_v31 = vld [vmem:[#allocation4 + $0x1f8] sm:$0xff] }
  0x44   :  { %654 = vmatpush.msra.mxu0 %v173_v29  ;;  %1819 = vmatpush.msk.msra.mxu1 %vm225_vm0, %v206_v30  ;;  %v217_v29 = vld [vmem:[#allocation4 + $0x4e0] sm:$0x1]  ;;  %v91_v30 = vld [vmem:[#allocation4 + $0xf0] sm:$0xff] }
  0x45   :  { %774 = vmatpush.msrb.mxu2 %v179_v32  ;;  %1831 = vmatpush.msk.msrb.mxu3 %vm225_vm0, %v212_v33  ;;  %v86_v32 = vld [vmem:[#allocation4 + $0xc8] sm:$0xff]  ;;  %v185_v33 = vld [vmem:[#allocation4 + $0x3e0] sm:$0xff] }
  0x46   :  { %1810 = vmatmul.msk.f32.vlgmr.msrb.gmra.mxu0 %vm221_vm1, %v1980_v25  ;;  %674 = vmatpush.msra.mxu1 %v174_v35  ;;  %v92_v35 = vld [vmem:[#allocation4 + $0xf8] sm:$0xff] }
  0x47   :  { %655 = vmatpush.msra.mxu0 %v141_v34  ;;  %1822 = vmatmul.msk.f32.vlgmr.msra.gmra.mxu2 %vm221_vm1, %v1980_v25  ;;  %v218_v34 = vld [vmem:[#allocation4 + $0x4e8] sm:$0x1] }
  0x48   :  { %794 = vmatpush.msrb.mxu3 %v180_v36  ;;  %775 = vmatpush.msrb.mxu2 %v147_v37  ;;  %v153_v36 = vld [vmem:[#allocation4 + $0x2e0] sm:$0xff]  ;;  %v186_v37 = vld [vmem:[#allocation4 + $0x3e8] sm:$0xff] }
  0x49   :  { %1812 = vmatmul.msk.f32.vlgmr.msrb.gmra.mxu1 %vm221_vm1, %v1980_v25  ;;  %656 = vmatpush.msra.mxu0 %v109_v38  ;;  %v121_v38 = vld [vmem:[#allocation4 + $0x1e0] sm:$0xff] }
  0x4a   :  { %675 = vmatpush.msra.mxu1 %v142_v39  ;;  %1824 = vmatmul.msk.f32.vlgmr.msra.gmra.mxu3 %vm221_vm1, %v1980_v25  ;;  %v154_v39 = vld [vmem:[#allocation4 + $0x2e8] sm:$0xff] }
  0x4b   :  { %776 = vmatpush.msrb.mxu2 %v115_v40  ;;  %795 = vmatpush.msrb.mxu3 %v148_v41  ;;  %v89_v40 = vld [vmem:[#allocation4 + $0xe0] sm:$0xff]  ;;  %v122_v41 = vld [vmem:[#allocation4 + $0x1e8] sm:$0xff] }
  0x4c   :  { %657 = vmatpush.msra.mxu0 %v77_v42  ;;  %676 = vmatpush.msra.mxu1 %v110_v43  ;;  %v90_v42 = vld [vmem:[#allocation4 + $0xe8] sm:$0xff]  ;;  %v997_v43 = vld [vmem:[#allocation6 + $0x18] sm:$0x77] }
  0x4d   :  { %777 = vmatpush.msrb.mxu2 %v83_v45  ;;  %796 = vmatpush.msrb.mxu3 %v116_v46  ;;  %1036 = vst [vmem:[#allocation1 + $0x30] ss:$2 sm:$0xff] %v997_v43  ;;  %v1001_v45 = vld [vmem:[#allocation6 + $0x38] sm:$0x77] }
  0x4e   :  { %1825 = vmatpush.msk.msrb.mxu0 %vm225_vm0, %v209_v44  ;;  %677 = vmatpush.msra.mxu1 %v78_v47  ;;  %v996_v44 = vld [vmem:[#allocation6 + $0x10] sm:$0x77] }
  0x4f   :  { %1837 = vmatpush.msk.msra.mxu2 %vm225_vm0, %v215_v48  ;;  %797 = vmatpush.msrb.mxu3 %v84_v51  ;;  %1034 = vst [vmem:[#allocation1 + $0x20] ss:$2 sm:$0xff] %v996_v44  ;;  %v1000_v48 = vld [vmem:[#allocation6 + $0x30] sm:$0x77]  ;;  %v1003_v51 = vld [vmem:[#allocation6 + $0x48] sm:$0x77] }
  0x50   :  { %734 = vmatpush.msrb.mxu0 %v177_v49  ;;  %1827 = vmatpush.msk.msrb.mxu1 %vm225_vm0, %v210_v50 }
  0x51   :  { %1818 = vmatmul.msk.f32.vlgmr.msra.gmra.mxu0 %vm221_vm1, %v1980_v25  ;;  %1830 = vmatmul.msk.f32.vlgmr.msrb.gmra.mxu2 %vm221_vm1, %v1980_v25 }
  0x52   :  { %1839 = vmatpush.msk.msra.mxu3 %vm225_vm0, %v216_v52  ;;  %854 = vmatpush.msra.mxu2 %v183_v53  ;;  %v1052_v52 = vld.sshfl [vmem:[#allocation1 + $0x18] sm:$0xff pattern:$0x75316420]  ;;  %v1002_v53 = vld [vmem:[#allocation6 + $0x40] sm:$0x77] }
  0x53   :  { %735 = vmatpush.msrb.mxu0 %v145_v54  ;;  %754 = vmatpush.msrb.mxu1 %v178_v55  ;;  %v1049_v54 = vld.sshfl [vmem:[#allocation1] sm:$0xff pattern:$0x75316420]  ;;  %v1050_v55 = vld.sshfl [vmem:[#allocation1 + $0x8] sm:$0xff pattern:$0x75316420] }
  0x54   :  { %1832 = vmatmul.msk.f32.vlgmr.msrb.gmra.mxu3 %vm221_vm1, %v1980_v25  ;;  %1820 = vmatmul.msk.f32.vlgmr.msra.gmra.mxu1 %vm221_vm1, %v1980_v25  ;;  %v1043_v46 = vld.sshfl [vmem:[#allocation1 + $0x30] sm:$0xff pattern:$0x75316420]  ;;  %v1044_v47 = vld.sshfl [vmem:[#allocation1 + $0x38] sm:$0xff pattern:$0x75316420] }
  0x55   :  { %855 = vmatpush.msra.mxu2 %v151_v56  ;;  %874 = vmatpush.msra.mxu3 %v184_v59  ;;  %1048 = vst [vmem:[#allocation1 + $0x30] ss:$2 sm:$0xff] %v1001_v45 }
  0x56   :  { %736 = vmatpush.msrb.mxu0 %v113_v60  ;;  %755 = vmatpush.msrb.mxu1 %v146_v61  ;;  %v1041_v49 = vld.sshfl [vmem:[#allocation1 + $0x20] sm:$0xff pattern:$0x75316420]  ;;  %v1042_v50 = vld.sshfl [vmem:[#allocation1 + $0x28] sm:$0xff pattern:$0x75316420] }
  0x57   :  { %856 = vmatpush.msra.mxu2 %v119_v62  ;;  %875 = vmatpush.msra.mxu3 %v152_v63  ;;  %1047 = vst [vmem:[#allocation1 + $0x20] ss:$2 sm:$0xff] %v1000_v48  ;;  %v1004_v61 = vld [vmem:[#allocation6 + $0x50] sm:$0x77] }
  0x58   :  { %737 = vmatpush.msrb.mxu0 %v81_v0  ;;  %756 = vmatpush.msrb.mxu1 %v114_v1  ;;  %1057 = vst [vmem:[#allocation1] ss:$2 sm:$0xff] %v1002_v53 }
  0x59   :  { %857 = vmatpush.msra.mxu2 %v87_v3  ;;  %876 = vmatpush.msra.mxu3 %v120_v4 }
  0x5a   :  { %1833 = vmatpush.msk.msra.mxu0 %vm225_vm0, %v213_v2  ;;  %757 = vmatpush.msrb.mxu1 %v82_v5 }
  0x5b   :  { %1845 = vmatpush.msk.msrb.mxu2 %vm225_vm0, %v219_v6  ;;  %1826 = vmatmul.msk.f32.vlgmr.msrb.gmra.mxu0 %vm221_vm1, %v1980_v25 }
  0x5c   :  { %1835 = vmatpush.msk.msra.mxu1 %vm225_vm0, %v214_v9  ;;  %814 = vmatpush.msra.mxu0 %v181_v8  ;;  %v1055_v56 = vld.sshfl [vmem:[#allocation1 + $0x30] sm:$0xff pattern:$0x75316420]  ;;  %v1056_v59 = vld.sshfl [vmem:[#allocation1 + $0x38] sm:$0xff pattern:$0x75316420] }
  0x5d   :  { %1838 = vmatmul.msk.f32.vlgmr.msra.gmra.mxu2 %vm221_vm1, %v1980_v25  ;;  %877 = vmatpush.msra.mxu3 %v88_v13  ;;  %1060 = vst [vmem:[#allocation1 + $0x30] ss:$2 sm:$0xff] %v1005_v57 }
  0x5e   :  { %934 = vmatpush.msrb.mxu2 %v187_v14  ;;  %1828 = vmatmul.msk.f32.vlgmr.msrb.gmra.mxu1 %vm221_vm1, %v1980_v25  ;;  %v1053_v58 = vld.sshfl [vmem:[#allocation1 + $0x20] sm:$0xff pattern:$0x75316420]  ;;  %v1054_v63 = vld.sshfl [vmem:[#allocation1 + $0x28] sm:$0xff pattern:$0x75316420] }
  0x5f   :  { %1847 = vmatpush.msk.msrb.mxu3 %vm225_vm0, %v220_v15  ;;  %815 = vmatpush.msra.mxu0 %v149_v18  ;;  %1059 = vst [vmem:[#allocation1 + $0x20] ss:$2 sm:$0xff] %v1004_v61  ;;  %v1061_v8 = vld.sshfl [vmem:[#allocation1] sm:$0xff pattern:$0x75316420] }
  0x60   :  { %834 = vmatpush.msra.mxu1 %v182_v19  ;;  %1840 = vmatmul.msk.f32.vlgmr.msra.gmra.mxu3 %vm221_vm1, %v1980_v25  ;;  %v1062_v13 = vld.sshfl [vmem:[#allocation1 + $0x8] sm:$0xff pattern:$0x75316420] }
  0x61   :  { %935 = vmatpush.msrb.mxu2 %v155_v20  ;;  %954 = vmatpush.msrb.mxu3 %v188_v21  ;;  %v1009_v21 = vld [vmem:[#allocation6 + $0x78] sm:$0x77] }
  0x62   :  { %816 = vmatpush.msra.mxu0 %v117_v22  ;;  %835 = vmatpush.msra.mxu1 %v150_v23 }
  0x63   :  { %936 = vmatpush.msrb.mxu2 %v123_v24  ;;  %955 = vmatpush.msrb.mxu3 %v156_v26  ;;  %v1008_v26 = vld [vmem:[#allocation6 + $0x70] sm:$0x77] }
  0x64   :  { %817 = vmatpush.msra.mxu0 %v85_v27  ;;  %836 = vmatpush.msra.mxu1 %v118_v28  ;;  %v1067_v20 = vld.sshfl [vmem:[#allocation1 + $0x30] sm:$0xff pattern:$0x75316420]  ;;  %v1068_v23 = vld.sshfl [vmem:[#allocation1 + $0x38] sm:$0xff pattern:$0x75316420] }
  0x65   :  { %937 = vmatpush.msrb.mxu2 %v91_v30  ;;  %956 = vmatpush.msrb.mxu3 %v124_v31  ;;  %1072 = vst [vmem:[#allocation1 + $0x30] ss:$2 sm:$0xff] %v1009_v21 }
  0x66   :  { %1841 = vmatpush.msk.msrb.mxu0 %vm225_vm0, %v217_v29  ;;  %837 = vmatpush.msra.mxu1 %v86_v32  ;;  %v1065_v22 = vld.sshfl [vmem:[#allocation1 + $0x20] sm:$0xff pattern:$0x75316420]  ;;  %v1066_v28 = vld.sshfl [vmem:[#allocation1 + $0x28] sm:$0xff pattern:$0x75316420] }
  0x67   :  { %1834 = vmatmul.msk.f32.vlgmr.msra.gmra.mxu0 %vm221_vm1, %v1980_v25  ;;  %1846 = vmatmul.msk.f32.vlgmr.msrb.gmra.mxu2 %vm221_vm1, %v1980_v25  ;;  %1071 = vst [vmem:[#allocation1 + $0x20] ss:$2 sm:$0xff] %v1008_v26 }
  0x68   :  { %894 = vmatpush.msrb.mxu0 %v185_v33  ;;  %1843 = vmatpush.msk.msrb.mxu1 %vm225_vm0, %v218_v34 }
  0x69   :  { %957 = vmatpush.msrb.mxu3 %v92_v35  ;;  %1836 = vmatmul.msk.f32.vlgmr.msra.gmra.mxu1 %vm221_vm1, %v1980_v25 }
  0x6a   :  { %1848 = vmatmul.msk.f32.vlgmr.msrb.gmra.mxu3 %vm221_vm1, %v1980_v25  ;;  %895 = vmatpush.msrb.mxu0 %v153_v36 }
  0x6b   :  { %914 = vmatpush.msrb.mxu1 %v186_v37  ;;  %1168 = vmatpush.xpose.msra.mxu2 %v2047_v11  ;;  %v1006_v11 = vld [vmem:[#allocation6 + $0x60] sm:$0x77] }
  0x6c   :  { %1188 = vmatpush.xpose.msra.mxu3 %v2049_v12  ;;  %896 = vmatpush.msrb.mxu0 %v121_v38  ;;  %1069 = vst [vmem:[#allocation1] ss:$2 sm:$0xff] %v1006_v11 }
  0x6d   :  { %915 = vmatpush.msrb.mxu1 %v154_v39 }
  0x6e   :  { %897 = vmatpush.msrb.mxu0 %v89_v40 }
  0x6f   :  { %916 = vmatpush.msrb.mxu1 %v122_v41  ;;  %1842 = vmatmul.msk.f32.vlgmr.msrb.gmra.mxu0 %vm221_vm1, %v1980_v25 }
  0x70   :  { %1128 = vmatpush.xpose.msra.mxu0 %v2055_v16  ;;  %1248 = vmatpush.xpose.msrb.mxu2 %v1043_v46 }
  0x71   :  { %917 = vmatpush.msrb.mxu1 %v90_v42  ;;  %1268 = vmatpush.xpose.msrb.mxu3 %v1044_v47 }
  0x72   :  { %1844 = vmatmul.msk.f32.vlgmr.msrb.gmra.mxu1 %vm221_vm1, %v1980_v25  ;;  %v1051_v25 = vld.sshfl [vmem:[#allocation1 + $0x10] sm:$0xff pattern:$0x75316420] }
  0x73   :  { %1148 = vmatpush.xpose.msra.mxu1 %v2057_v17  ;;  %1058 = vst [vmem:[#allocation1 + $0x10] ss:$2 sm:$0xff] %v1003_v51  ;;  %v1073_v48 = vld.sshfl [vmem:[#allocation1] sm:$0xff pattern:$0x75316420] }
  0x74   :  { %1208 = vmatpush.xpose.msrb.mxu0 %v1041_v49  ;;  %v1074_v53 = vld.sshfl [vmem:[#allocation1 + $0x8] sm:$0xff pattern:$0x75316420] }
  0x77   :  { %1228 = vmatpush.xpose.msrb.mxu1 %v1042_v50 }
  0x7a   :  { %v1063_v6 = vld.sshfl [vmem:[#allocation1 + $0x10] sm:$0xff pattern:$0x75316420]  ;;  %v1064_v9 = vld.sshfl [vmem:[#allocation1 + $0x18] sm:$0xff pattern:$0x75316420] }
  0x7b   :  { %1070 = vst [vmem:[#allocation1 + $0x10] ss:$2 sm:$0xff] %v1007_v7 }
  0x82   :  { %v1075_v45 = vld.sshfl [vmem:[#allocation1 + $0x10] sm:$0xff pattern:$0x75316420]  ;;  %v1076_v51 = vld.sshfl [vmem:[#allocation1 + $0x18] sm:$0xff pattern:$0x75316420] }
  0x9c   :  { %v379_v60 = vpop.f32.mrf.mxu2 }
  0x9d   :  { %v964_v62 = vmax.f32 %v379_v60, 0.0 }
  0x9f   :  { %v399_v0 = vpop.f32.mrf.mxu3  ;;  %1169 = vmatmul.f32.vlgmr.msra.gmra.mxu2 %v964_v62  ;;  %v1077_v62 = vld.sshfl [vmem:[#allocation1 + $0x20] sm:$0xff pattern:$0x75316420] }
  0xa0   :  { %v339_v1 = vpop.f32.mrf.mxu0  ;;  %v965_v2 = vmax.f32 %v399_v0, 0.0  ;;  %1328 = vmatpush.xpose.msra.mxu2 %v1051_v25 }
  0xa1   :  { %v962_v3 = vmax.f32 %v339_v1, 0.0  ;;  %v1078_v1 = vld.sshfl [vmem:[#allocation1 + $0x28] sm:$0xff pattern:$0x75316420] }
  0xa2   :  { %1189 = vmatmul.f32.vlgmr.msra.gmra.mxu3 %v965_v2 }
  0xa3   :  { %1129 = vmatmul.f32.vlgmr.msra.gmra.mxu0 %v962_v3  ;;  %1348 = vmatpush.xpose.msra.mxu3 %v1052_v52 }
  0xa4   :  { %v359_v4 = vpop.f32.mrf.mxu1  ;;  %1288 = vmatpush.xpose.msra.mxu0 %v1049_v54 }
  0xa5   :  { %v963_v5 = vmax.f32 %v359_v4, 0.0 }
  0xa7   :  { %1149 = vmatmul.f32.vlgmr.msra.gmra.mxu1 %v963_v5 }
  0xa8   :  { %v459_v10 = vpop.f32.mrf.mxu2  ;;  %1308 = vmatpush.xpose.msra.mxu1 %v1050_v55 }
  0xa9   :  { %v968_v12 = vmax.f32 %v459_v10, 0.0 }
  0xab   :  { %v479_v14 = vpop.f32.mrf.mxu3  ;;  %1249 = vmatmul.f32.vlgmr.msrb.gmra.mxu2 %v968_v12 }
  0xac   :  { %v969_v15 = vmax.f32 %v479_v14, 0.0  ;;  %v419_v16 = vpop.f32.mrf.mxu0  ;;  %1408 = vmatpush.xpose.msrb.mxu2 %v1055_v56  ;;  %v1079_v56 = vld.sshfl [vmem:[#allocation1 + $0x30] sm:$0xff pattern:$0x75316420] }
  0xad   :  { %v966_v17 = vmax.f32 %v419_v16, 0.0 }
  0xae   :  { %1269 = vmatmul.f32.vlgmr.msrb.gmra.mxu3 %v969_v15 }
  0xaf   :  { %1428 = vmatpush.xpose.msrb.mxu3 %v1056_v59  ;;  %1209 = vmatmul.f32.vlgmr.msrb.gmra.mxu0 %v966_v17  ;;  %v1080_v59 = vld.sshfl [vmem:[#allocation1 + $0x38] sm:$0xff pattern:$0x75316420] }
  0xb0   :  { %v439_v18 = vpop.f32.mrf.mxu1  ;;  %1368 = vmatpush.xpose.msrb.mxu0 %v1053_v58 }
  0xb1   :  { %v967_v19 = vmax.f32 %v439_v18, 0.0  ;;  %v1854_v18 = vld [vmem:[%s2096_s3] ss:$0 sm:$0xff] }
  0xb3   :  { %1229 = vmatmul.f32.vlgmr.msrb.gmra.mxu1 %v967_v19 }
  0xb4   :  { %1388 = vmatpush.xpose.msrb.mxu1 %v1054_v63  ;;  %v539_v24 = vpop.f32.mrf.mxu2 }
  0xb5   :  { %v972_v27 = vmax.f32 %v539_v24, 0.0 }
  0xb7   :  { %v559_v30 = vpop.f32.mrf.mxu3  ;;  %1329 = vmatmul.f32.vlgmr.msra.gmra.mxu2 %v972_v27 }
  0xb8   :  { %v499_v29 = vpop.f32.mrf.mxu0  ;;  %v973_v32 = vmax.f32 %v559_v30, 0.0  ;;  %1488 = vmatpush.xpose.msra.mxu2 %v1063_v6 }
  0xb9   :  { %v970_v31 = vmax.f32 %v499_v29, 0.0 }
  0xba   :  { %1349 = vmatmul.f32.vlgmr.msra.gmra.mxu3 %v973_v32 }
  0xbb   :  { %1289 = vmatmul.f32.vlgmr.msra.gmra.mxu0 %v970_v31  ;;  %v519_v33 = vpop.f32.mrf.mxu1  ;;  %1508 = vmatpush.xpose.msra.mxu3 %v1064_v9 }
  0xbc   :  { %1448 = vmatpush.xpose.msra.mxu0 %v1061_v8  ;;  %v971_v34 = vmax.f32 %v519_v33, 0.0 }
  0xbe   :  { %1309 = vmatmul.f32.vlgmr.msra.gmra.mxu1 %v971_v34  ;;  %v619_v35 = vpop.f32.mrf.mxu2 }
  0xbf   :  { %v976_v36 = vmax.f32 %v619_v35, 0.0  ;;  %1468 = vmatpush.xpose.msra.mxu1 %v1062_v13 }
  0xc1   :  { %v639_v37 = vpop.f32.mrf.mxu3  ;;  %1409 = vmatmul.f32.vlgmr.msrb.gmra.mxu2 %v976_v36 }
  0xc2   :  { %v977_v38 = vmax.f32 %v639_v37, 0.0  ;;  %1568 = vmatpush.xpose.msrb.mxu2 %v1067_v20 }
  0xc3   :  { %v579_v39 = vpop.f32.mrf.mxu0 }
  0xc4   :  { %v974_v40 = vmax.f32 %v579_v39, 0.0  ;;  %1429 = vmatmul.f32.vlgmr.msrb.gmra.mxu3 %v977_v38 }
  0xc5   :  { %1588 = vmatpush.xpose.msrb.mxu3 %v1068_v23 }
  0xc6   :  { %v599_v41 = vpop.f32.mrf.mxu1  ;;  %1369 = vmatmul.f32.vlgmr.msrb.gmra.mxu0 %v974_v40 }
  0xc7   :  { %v975_v42 = vmax.f32 %v599_v41, 0.0  ;;  %1528 = vmatpush.xpose.msrb.mxu0 %v1065_v22 }
  0xc9   :  { %1389 = vmatmul.f32.vlgmr.msrb.gmra.mxu1 %v975_v42 }
  0xca   :  { %1548 = vmatpush.xpose.msrb.mxu1 %v1066_v28  ;;  %v699_v43 = vpop.f32.mrf.mxu2 }
  0xcb   :  { %v980_v44 = vmax.f32 %v699_v43, 0.0 }
  0xcd   :  { %v719_v47 = vpop.f32.mrf.mxu3  ;;  %1489 = vmatmul.f32.vlgmr.msra.gmra.mxu2 %v980_v44 }
  0xce   :  { %v659_v46 = vpop.f32.mrf.mxu0  ;;  %v981_v50 = vmax.f32 %v719_v47, 0.0  ;;  %1648 = vmatpush.xpose.msra.mxu2 %v1075_v45 }
  0xcf   :  { %v978_v49 = vmax.f32 %v659_v46, 0.0 }
  0xd0   :  { %1509 = vmatmul.f32.vlgmr.msra.gmra.mxu3 %v981_v50 }
  0xd1   :  { %1449 = vmatmul.f32.vlgmr.msra.gmra.mxu0 %v978_v49  ;;  %v679_v25 = vpop.f32.mrf.mxu1  ;;  %1668 = vmatpush.xpose.msra.mxu3 %v1076_v51 }
  0xd2   :  { %1608 = vmatpush.xpose.msra.mxu0 %v1073_v48  ;;  %v979_v52 = vmax.f32 %v679_v25, 0.0 }
  0xd4   :  { %1469 = vmatmul.f32.vlgmr.msra.gmra.mxu1 %v979_v52  ;;  %v779_v54 = vpop.f32.mrf.mxu2 }
  0xd5   :  { %v984_v55 = vmax.f32 %v779_v54, 0.0  ;;  %1628 = vmatpush.xpose.msra.mxu1 %v1074_v53 }
  0xd7   :  { %v799_v57 = vpop.f32.mrf.mxu3  ;;  %1569 = vmatmul.f32.vlgmr.msrb.gmra.mxu2 %v984_v55 }
  0xd8   :  { %v985_v58 = vmax.f32 %v799_v57, 0.0  ;;  %v739_v60 = vpop.f32.mrf.mxu0  ;;  %1728 = vmatpush.xpose.msrb.mxu2 %v1079_v56 }
  0xd9   :  { %v982_v61 = vmax.f32 %v739_v60, 0.0 }
  0xda   :  { %1589 = vmatmul.f32.vlgmr.msrb.gmra.mxu3 %v985_v58 }
  0xdb   :  { %1748 = vmatpush.xpose.msrb.mxu3 %v1080_v59  ;;  %v759_v63 = vpop.f32.mrf.mxu1  ;;  %1529 = vmatmul.f32.vlgmr.msrb.gmra.mxu0 %v982_v61 }
  0xdc   :  { %v983_v0 = vmax.f32 %v759_v63, 0.0  ;;  %1688 = vmatpush.xpose.msrb.mxu0 %v1077_v62 }
  0xde   :  { %1549 = vmatmul.f32.vlgmr.msrb.gmra.mxu1 %v983_v0 }
  0xdf   :  { %1708 = vmatpush.xpose.msrb.mxu1 %v1078_v1 }
  0xe0   :  { %v859_v2 = vpop.f32.mrf.mxu2 }
  0xe1   :  { %v988_v3 = vmax.f32 %v859_v2, 0.0 }
  0xe3   :  { %1649 = vmatmul.f32.vlgmr.msra.gmra.mxu2 %v988_v3  ;;  %v879_v5 = vpop.f32.mrf.mxu3 }
  0xe4   :  { %v819_v4 = vpop.f32.mrf.mxu0  ;;  %v989_v7 = vmax.f32 %v879_v5, 0.0 }
  0xe5   :  { %v986_v6 = vmax.f32 %v819_v4, 0.0 }
  0xe6   :  { %v839_v8 = vpop.f32.mrf.mxu1  ;;  %1669 = vmatmul.f32.vlgmr.msra.gmra.mxu3 %v989_v7 }
  0xe7   :  { %1609 = vmatmul.f32.vlgmr.msra.gmra.mxu0 %v986_v6  ;;  %v987_v9 = vmax.f32 %v839_v8, 0.0 }
  0xe9   :  { %1629 = vmatmul.f32.vlgmr.msra.gmra.mxu1 %v987_v9 }
  0xea   :  { %v939_v10 = vpop.f32.mrf.mxu2 }
  0xeb   :  { %v992_v11 = vmax.f32 %v939_v10, 0.0 }
  0xec   :  { %v899_v12 = vpop.f32.mrf.mxu0 }
  0xed   :  { %v959_v13 = vpop.f32.mrf.mxu3  ;;  %v990_v14 = vmax.f32 %v899_v12, 0.0  ;;  %1729 = vmatmul.f32.vlgmr.msrb.gmra.mxu2 %v992_v11 }
  0xee   :  { %v993_v15 = vmax.f32 %v959_v13, 0.0 }
  0xef   :  { %v919_v16 = vpop.f32.mrf.mxu1  ;;  %1689 = vmatmul.f32.vlgmr.msrb.gmra.mxu0 %v990_v14 }
  0xf0   :  { %v991_v17 = vmax.f32 %v919_v16, 0.0  ;;  %1749 = vmatmul.f32.vlgmr.msrb.gmra.mxu3 %v993_v15 }
  0xf2   :  { %1709 = vmatmul.f32.vlgmr.msrb.gmra.mxu1 %v991_v17 }
 0x120   :  { %v1130_v19 = vpop.f32.mrf.mxu0 }
 0x121   :  { %v1131_v20 = vadd.f32 %v1854_v18, %v1130_v19 }
 0x122   :  { %v1170_v22 = vpop.f32.mrf.mxu2 }
 0x124   :  { %v1150_v21 = vpop.f32.mrf.mxu1 }
 0x125   :  { %v1151_v23 = vadd.f32 %v1150_v21, %v1131_v20  ;;  %v1190_v24 = vpop.f32.mrf.mxu3 }
 0x127   :  { %v1171_v26 = vadd.f32 %v1170_v22, %v1151_v23 }
 0x129   :  { %v1191_v27 = vadd.f32 %v1190_v24, %v1171_v26 }
 0x12c   :  { %v1210_v28 = vpop.f32.mrf.mxu0 }
 0x12d   :  { %v1211_v29 = vadd.f32 %v1210_v28, %v1191_v27 }
 0x12e   :  { %v1250_v31 = vpop.f32.mrf.mxu2 }
 0x130   :  { %v1230_v30 = vpop.f32.mrf.mxu1 }
 0x131   :  { %v1231_v32 = vadd.f32 %v1230_v30, %v1211_v29  ;;  %v1270_v33 = vpop.f32.mrf.mxu3 }
 0x133   :  { %v1251_v34 = vadd.f32 %v1250_v31, %v1231_v32 }
 0x135   :  { %v1271_v35 = vadd.f32 %v1270_v33, %v1251_v34 }
 0x138   :  { %v1290_v36 = vpop.f32.mrf.mxu0 }
 0x139   :  { %v1291_v37 = vadd.f32 %v1290_v36, %v1271_v35 }
 0x13a   :  { %v1330_v39 = vpop.f32.mrf.mxu2 }
 0x13b   :  { %v1310_v38 = vpop.f32.mrf.mxu1 }
 0x13c   :  { %v1311_v40 = vadd.f32 %v1310_v38, %v1291_v37 }
 0x13d   :  { %v1350_v41 = vpop.f32.mrf.mxu3 }
 0x13e   :  { %v1331_v42 = vadd.f32 %v1330_v39, %v1311_v40 }
 0x140   :  { %v1351_v43 = vadd.f32 %v1350_v41, %v1331_v42 }
 0x143   :  { %v1370_v44 = vpop.f32.mrf.mxu0 }
 0x144   :  { %v1371_v45 = vadd.f32 %v1370_v44, %v1351_v43  ;;  %v1410_v47 = vpop.f32.mrf.mxu2 }
 0x146   :  { %v1390_v46 = vpop.f32.mrf.mxu1 }
 0x147   :  { %v1391_v48 = vadd.f32 %v1390_v46, %v1371_v45  ;;  %v1430_v49 = vpop.f32.mrf.mxu3 }
 0x149   :  { %v1411_v50 = vadd.f32 %v1410_v47, %v1391_v48 }
 0x14b   :  { %v1431_v51 = vadd.f32 %v1430_v49, %v1411_v50 }
 0x14e   :  { %v1450_v25 = vpop.f32.mrf.mxu0 }
 0x14f   :  { %v1451_v52 = vadd.f32 %v1450_v25, %v1431_v51 }
 0x150   :  { %v1490_v54 = vpop.f32.mrf.mxu2 }
 0x151   :  { %v1470_v53 = vpop.f32.mrf.mxu1 }
 0x152   :  { %v1471_v55 = vadd.f32 %v1470_v53, %v1451_v52 }
 0x153   :  { %v1510_v56 = vpop.f32.mrf.mxu3 }
 0x154   :  { %v1491_v57 = vadd.f32 %v1490_v54, %v1471_v55 }
 0x156   :  { %v1511_v58 = vadd.f32 %v1510_v56, %v1491_v57 }
 0x158   :  { %v1530_v59 = vpop.f32.mrf.mxu0 }
 0x159   :  { %v1531_v60 = vadd.f32 %v1530_v59, %v1511_v58 }
 0x15a   :  { %v1570_v62 = vpop.f32.mrf.mxu2 }
 0x15b   :  { %v1550_v61 = vpop.f32.mrf.mxu1 }
 0x15c   :  { %v1551_v63 = vadd.f32 %v1550_v61, %v1531_v60 }
 0x15d   :  { %v1590_v0 = vpop.f32.mrf.mxu3 }
 0x15e   :  { %v1571_v1 = vadd.f32 %v1570_v62, %v1551_v63 }
 0x160   :  { %v1591_v2 = vadd.f32 %v1590_v0, %v1571_v1 }
 0x164   :  { %v1610_v3 = vpop.f32.mrf.mxu0 }
 0x165   :  { %v1611_v4 = vadd.f32 %v1610_v3, %v1591_v2 }
 0x166   :  { %v1630_v5 = vpop.f32.mrf.mxu1  ;;  %v1650_v6 = vpop.f32.mrf.mxu2 }
 0x167   :  { %v1631_v7 = vadd.f32 %v1630_v5, %v1611_v4 }
 0x169   :  { %v1651_v8 = vadd.f32 %v1650_v6, %v1631_v7  ;;  %v1670_v9 = vpop.f32.mrf.mxu3 }
 0x16b   :  { %v1671_v10 = vadd.f32 %v1670_v9, %v1651_v8 }
 0x16c   :  { %v1690_v11 = vpop.f32.mrf.mxu0 }
 0x16d   :  { %v1691_v12 = vadd.f32 %v1690_v11, %v1671_v10 }
 0x16f   :  { %v1710_v13 = vpop.f32.mrf.mxu1 }
 0x170   :  { %v1711_v14 = vadd.f32 %v1710_v13, %v1691_v12  ;;  %v1730_v15 = vpop.f32.mrf.mxu2 }
 0x172   :  { %v1731_v16 = vadd.f32 %v1730_v15, %v1711_v14 }
 0x173   :  { %v1750_v17 = vpop.f32.mrf.mxu3 }
 0x174   :  { %v1751_v18 = vadd.f32 %v1750_v17, %v1731_v16 }
 0x176   :  { %v1754_v19 = vsel %vm1753_vm2, %v1751_v18, -inf }
 0x177   :  { %1755 = vmax.xlane.f32.xlu0 %v1754_v19 }
 0x1ea   :  { %v1756_v20 = vpop.xlane.xlu0 %1755 }
 0x1eb   :  { %v1757_v21 = vsub.f32 %v1751_v18, %v1756_v20 }
 0x1ed   :  { %v1758_v22 = vmul.f32 1.442695, %v1757_v21 }
 0x1ef   :  { %1855 = vpow2.f32 %v1758_v22 }
 0x1f5   :  { %v1856_v23 = vpop.eup %1855 }
 0x1f6   :  { %v1760_v24 = vsel %vm1753_vm2, %v1856_v23, 0.0 }
 0x1f7   :  { %1761 = vadd.xlane.f32.xlu0 %v1760_v24 }
 0x26a   :  { %v1762_v26 = vpop.xlane.xlu0 %1761 }
 0x26b   :  { %1857 = vrcp.f32 %v1762_v26  ;;  %v1774_v30 = vand.u32 2147483648, %v1762_v26  ;;  %v1772_v32 = vand.u32 2147483647, %v1762_v26  ;;  %vm1768_vm4 = vweird.f32 %v1762_v26 }
 0x26d   :  { %v1775_v34 = vor.u32 1.1754944e-38, %v1774_v30  ;;  %vm1773_vm6 = vcmp.eq.f32.partialorder %v1772_v32, 8.507059e+37 }
 0x271   :  { %v1858_v27 = vpop.eup %1857 }
 0x272   :  { %v1764_v28 = vmul.f32 %v1858_v27, %v1762_v26  ;;  %vm1769_vm3 = vweird.f32 %v1858_v27 }
 0x273   :  { %vm1770_vm5 = vmor %vm1768_vm4, %vm1769_vm3 }
 0x274   :  { %v1765_v29 = vsub.f32 1.0, %v1764_v28 }
 0x276   :  { %v1766_v31 = vmul.f32 %v1858_v27, %v1765_v29 }
 0x278   :  { %v1767_v33 = vadd.f32 %v1858_v27, %v1766_v31 }
 0x27a   :  { %v1771_v35 = vsel %vm1770_vm5, %v1858_v27, %v1767_v33 }
 0x27b   :  { %v1776_v36 = vsel %vm1773_vm6, %v1775_v34, %v1771_v35 }
 0x27c   :  { %v1777_v37 = vmul.f32 %v1856_v23, %v1776_v36 }
 0x27e   :  { %1778 = vst.msk [vmem:[%s2097_s4] sm:$0xff] %vm1753_vm2, %v1777_v37 }
 0x27f   :  { %1783 = vsyncpa [#allocation3], 1 }
 0x280   :  { %1784 = vsyncpa [#allocation5], 1 }

</bundles_post_ra>
